<compile_context>
chip_gen: v7x
topology: tpu7x:2x2x1
jax: 0.10.0
libtpu: 0.0.40
codegen_flags: <defaults>
</compile_context>

<pallas_src>
import math
import jax
import jax.numpy as jnp
from jax.experimental import pallas as pl
from jax.experimental.pallas import tpu as pltpu

_LANE = 128
_MAX_TN = 32768
_VMEM_CAP_BYTES = 48 << 20          # keep headroom under v7x's 64 MiB VMEM


def _round_up(x, m):
    return ((x + m - 1) // m) * m


def _cdiv(a, b):
    return (a + b - 1) // b


def _choose_tiling(n, s, weight_bytes, target_weight_tile_bytes):
    """Pick (tn, n_padded) so that:
      * each weight tile moves ~target_weight_tile_bytes of HBM,
      * tn is a multiple of 128 and divides n_padded exactly (full unmasked
        stores, no OOB weight reads on a ragged last tile),
      * the grid keeps >=2 (even) steps when N is large enough, so the
        "parallel" axis can shard across v7x's two TensorCores.
    """
    np128 = _round_up(max(n, 1), _LANE)
    tn_target = target_weight_tile_bytes // max(s * weight_bytes, 1)
    tn_target = max(_LANE, min(_MAX_TN, (tn_target // _LANE) * _LANE))
    g = max(1, _cdiv(np128, tn_target))
    if np128 >= 2 * _LANE:
        g = max(g, 2)                # >=2 steps for v7x dual-TC sharding
        if g % 2:
            g += 1                   # prefer an even number of steps
    tn = _round_up(_cdiv(np128, g), _LANE)
    return tn, tn * g


def _linear_bf16_kernel(x_ref, wt_ref, b_ref, o_ref):
    # In-kernel bf16 cast of the (small, resident) x tile; f32 accumulation
    # on the MXU; f32 bias add; full-lane unmasked store.
    x = x_ref[...].astype(jnp.bfloat16)
    acc = jnp.dot(x, wt_ref[...], preferred_element_type=jnp.float32)
    o_ref[...] = (acc + b_ref[...]).astype(o_ref.dtype)


def _linear_int8_kernel(x_ref, wq_ref, scale_ref, b_ref, o_ref):
    # Weight streamed from HBM as int8 (half the bytes of bf16); dequantized
    # via a per-output-channel scale applied to the f32 accumulator.  The
    # int8 -> bf16 cast is exact (|q| <= 127) and runs on the VPU, which has
    # slack because this kernel is HBM-bound.
    x = x_ref[...].astype(jnp.bfloat16)
    w = wq_ref[...].astype(jnp.bfloat16)
    acc = jnp.dot(x, w, preferred_element_type=jnp.float32)
    o_ref[...] = (acc * scale_ref[...] + b_ref[...]).astype(o_ref.dtype)


def prepare_action_selection_params(weight, bias, *, weight_dtype=jnp.bfloat16,
                                     target_weight_tile_bytes=2 << 20):
    """One-time parameter prep (run at module init, not per call).

    weight: [N, S] f32 (PyTorch nn.Linear layout); bias: [N] f32.
    weight_dtype:
      * jnp.bfloat16 : weight streamed as bf16 (default).
      * jnp.int8     : per-output-channel symmetric int8 quantization; the
                       kernel dequantizes after the matmul.  Halves the
                       dominant weight HBM traffic; valid on v5e/v6e/v7x.
    Returns a dict of prepped params + tiling metadata.
    """
    n, s = weight.shape
    wbytes = 1 if weight_dtype == jnp.int8 else 2
    tn, n_pad = _choose_tiling(n, s, wbytes, target_weight_tile_bytes)

    wt = jnp.transpose(weight).astype(jnp.float32)               # [S, N]
    wt = jnp.pad(wt, ((0, 0), (0, n_pad - n)))                   # [S, Np]
    b = jnp.pad(bias.astype(jnp.float32), (0, n_pad - n)).reshape(1, n_pad)

    if weight_dtype == jnp.int8:
        absmax = jnp.max(jnp.abs(wt), axis=0, keepdims=True)     # [1, Np]
        scale = jnp.where(absmax > 0.0, absmax / 127.0, 1.0).astype(jnp.float32)
        wq = jnp.clip(jnp.round(wt / scale), -127, 127).astype(jnp.int8)
        return {"wt": wq, "scale": scale, "bias": b, "tn": tn, "n_out": n}

    return {"wt": wt.astype(jnp.bfloat16), "scale": None, "bias": b,
            "tn": tn, "n_out": n}


def action_selection_forward(x, params):
    """out = x @ W.T + b  with x: [B, S] f32.  Returns [B, n_out] f32."""
    B, S = x.shape
    wt, scale, b = params["wt"], params["scale"], params["bias"]
    tn, n_out = params["tn"], params["n_out"]
    S2, Np = wt.shape
    assert S == S2 and Np % tn == 0 and tn % _LANE == 0

    grid = (Np // tn,)
    wbytes = wt.dtype.itemsize

    # Per-step VMEM (double-buffered weight/bias/scale/output) + x resident.
    per_step = (S * tn * wbytes + B * tn * 4 + tn * 4
                + (tn * 4 if scale is not None else 0))
    vmem_needed = 2 * per_step + 2 * B * S * 4
    vmem_limit = int(min(max(vmem_needed + (4 << 20), 16 << 20),
                         _VMEM_CAP_BYTES))

    bytes_accessed = (B * S * 4 + S * Np * wbytes + Np * 4 + B * Np * 4
                      + (Np * 4 if scale is not None else 0))
    cost = pl.CostEstimate(flops=2 * B * S * Np, transcendentals=0,
                           bytes_accessed=bytes_accessed)

    x_spec = pl.BlockSpec((B, S), lambda j: (0, 0))     # reused by every tile
    w_spec = pl.BlockSpec((S, tn), lambda j: (0, j))    # streamed weight tile
    v_spec = pl.BlockSpec((1, tn), lambda j: (0, j))    # bias / scale tile
    out_spec = pl.BlockSpec((B, tn), lambda j: (0, j))  # lane-dense output

    common = dict(
        out_shape=jax.ShapeDtypeStruct((B, Np), jnp.float32),
        grid=grid,
        out_specs=out_spec,
        compiler_params=pltpu.CompilerParams(
            dimension_semantics=("parallel",),          # megacore-shardable
            vmem_limit_bytes=vmem_limit),
        cost_estimate=cost,
    )

    if scale is None:
        out_padded = pl.pallas_call(
            _linear_bf16_kernel,
            in_specs=[x_spec, w_spec, v_spec],
            **common)(x, wt, b)
    else:
        out_padded = pl.pallas_call(
            _linear_int8_kernel,
            in_specs=[x_spec, w_spec, v_spec, v_spec],
            **common)(x, wt, scale, b)

    # Drop lane padding.  (If the consumer is an argmax/softmax over the
    # padded width, skip this slice and pad the bias with a large negative
    # value at prep time instead.)
    return out_padded[:, :n_out] if n_out != Np else out_padded


if __name__ == "__main__":
    # Small shapes consistent with the module:
    #   state_size = 32, len(node2id) = 64, batch = 8
    B, STATE_SIZE, NUM_NODES = 8, 32, 64

    key = jax.random.PRNGKey(0)
    kx, kw, kb = jax.random.split(key, 3)

    x = jax.random.normal(kx, (B, STATE_SIZE), dtype=jnp.float32)

    # Parameters (deterministic, synthetic).
    # xavier_normal_: std = sqrt(2 / (fan_in + fan_out))
    xavier_std = math.sqrt(2.0 / (STATE_SIZE + NUM_NODES))
    weight = xavier_std * jax.random.normal(
        kw, (NUM_NODES, STATE_SIZE), dtype=jnp.float32)
    # PyTorch Linear default bias init: U(-1/sqrt(fan_in), 1/sqrt(fan_in))
    bound = 1.0 / math.sqrt(STATE_SIZE)
    bias = jax.random.uniform(
        kb, (NUM_NODES,), minval=-bound, maxval=bound, dtype=jnp.float32)

    ref_f32 = x @ weight.T + bias

    # ---- bf16 weight-stream path (default) ----
    params_bf16 = prepare_action_selection_params(weight, bias)
    out_bf16 = jax.block_until_ready(action_selection_forward(x, params_bf16))
    assert out_bf16.shape == (B, NUM_NODES)

    ref_bf16 = jnp.dot(x.astype(jnp.bfloat16),
                       jnp.transpose(weight).astype(jnp.bfloat16),
                       preferred_element_type=jnp.float32) + bias
    assert jnp.allclose(out_bf16, ref_bf16, atol=1e-4, rtol=1e-4)
    # bf16 inputs change numerics vs the f32 nn.Linear — loose tolerance.
    assert jnp.allclose(out_bf16, ref_f32, atol=3e-2, rtol=3e-2)

    # ---- int8 weight-stream path (halves weight HBM traffic) ----
    params_i8 = prepare_action_selection_params(weight, bias,
                                                weight_dtype=jnp.int8)
    out_i8 = jax.block_until_ready(action_selection_forward(x, params_i8))
    assert out_i8.shape == (B, NUM_NODES)

    # Reference with identical quantization semantics.
    wq = params_i8["wt"][:, :NUM_NODES].astype(jnp.float32)       # [S, N]
    sc = params_i8["scale"][:, :NUM_NODES]                        # [1, N]
    ref_i8 = (x @ wq) * sc + bias
    assert jnp.allclose(out_i8, ref_i8, atol=2e-2, rtol=2e-2)

    print("KERNEL_OK")
</pallas_src>

<mosaic_0001>
module attributes {stable_mosaic.version = 11 : i64} {
  func.func @_linear_bf16_kernel(%arg0: i32, %arg1: memref<8x32xf32, #tpu.memory_space<vmem>>, %arg2: memref<32x128xbf16, #tpu.memory_space<vmem>>, %arg3: memref<1x128xf32, #tpu.memory_space<vmem>>, %arg4: memref<8x128xf32, #tpu.memory_space<vmem>>) attributes {dimension_semantics = [#tpu.dimension_semantics<parallel>], iteration_bounds = array<i64: 1>, scalar_prefetch = 0 : i64, scratch_operands = 0 : i64, tpu.core_type = #tpu.core_type<tc>, window_params = [{pipeline_mode = #tpu.pipeline_mode<synchronous>, transform_indices = @transform_0, window_bounds = array<i64: 8, 32>}, {transform_indices = @transform_1, window_bounds = array<i64: 32, 128>}, {transform_indices = @transform_2, window_bounds = array<i64: 1, 128>}, {transform_indices = @transform_3, window_bounds = array<i64: 8, 128>}]} {
    %c0 = arith.constant 0 : index
    %c0_0 = arith.constant 0 : index
    %0 = vector.load %arg1[%c0, %c0_0] : memref<8x32xf32, #tpu.memory_space<vmem>>, vector<8x32xf32>
    %1 = arith.truncf %0 : vector<8x32xf32> to vector<8x32xbf16>
    %c0_1 = arith.constant 0 : index
    %c0_2 = arith.constant 0 : index
    %2 = vector.load %arg2[%c0_1, %c0_2] : memref<32x128xbf16, #tpu.memory_space<vmem>>, vector<32x128xbf16>
    %cst = arith.constant dense<0.000000e+00> : vector<8x128xf32>
    %3 = tpu.matmul %1, %2, %cst {dimension_numbers = #tpu.dot_dimension_numbers<[1], [0], [0], [1], [0, 0, 1, 1], [], []>} : vector<8x32xbf16>, vector<32x128xbf16>, vector<8x128xf32> -> vector<8x128xf32>
    %c0_3 = arith.constant 0 : index
    %c0_4 = arith.constant 0 : index
    %4 = vector.load %arg3[%c0_3, %c0_4] : memref<1x128xf32, #tpu.memory_space<vmem>>, vector<1x128xf32>
    %5 = vector.broadcast %4 : vector<1x128xf32> to vector<8x128xf32>
    %6 = arith.addf %3, %5 : vector<8x128xf32>
    %c0_5 = arith.constant 0 : index
    %c0_6 = arith.constant 0 : index
    %7 = vector.load %arg4[%c0_5, %c0_6] : memref<8x128xf32, #tpu.memory_space<vmem>>, vector<8x128xf32>
    tpu.vector_store %arg4[%c0_5, %c0_6], %6 {strides = array<i32>} : memref<8x128xf32, #tpu.memory_space<vmem>>, vector<8x128xf32>,
    return
  }
  func.func @transform_0(%arg0: i32) -> (i32, i32) {
    %c0_i32 = arith.constant 0 : i32
    %c0_i32_0 = arith.constant 0 : i32
    %c0_i32_1 = arith.constant 0 : i32
    return %c0_i32, %c0_i32_0 : i32, i32
  }
  func.func @transform_1(%arg0: i32) -> (i32, i32) {
    %c0_i32 = arith.constant 0 : i32
    %c0_i32_0 = arith.constant 0 : i32
    return %c0_i32, %arg0 : i32, i32
  }
  func.func @transform_2(%arg0: i32) -> (i32, i32) {
    %c0_i32 = arith.constant 0 : i32
    %c0_i32_0 = arith.constant 0 : i32
    return %c0_i32, %arg0 : i32, i32
  }
  func.func @transform_3(%arg0: i32) -> (i32, i32) {
    %c0_i32 = arith.constant 0 : i32
    %c0_i32_0 = arith.constant 0 : i32
    return %c0_i32, %arg0 : i32, i32
  }
}

</mosaic_0001>

<bundles_post_ra>
// kernel: tpu_custom_call.1
= control target key start
LH: loop header
LB: loop body
LE: loop exit
PB: predicated region body
PF: predicated region fallthrough
CT: control target
= control target key end

     0   :  { %8 = vsyncpa [#allocation3], 0  ;;  %s297_s0 = inlined_call_operand.hbm [shape: f32[8,32], index: 0, kind: input, shape index: {}]   ;;  %s298_s1 = inlined_call_operand.hbm [shape: bf16[32,128], index: 1, kind: input, shape index: {}]   ;;  %s299_s2 = inlined_call_operand.vmem [shape: f32[1,128], index: 2, kind: input, shape index: {}]   ;;  %s300_s3 = inlined_call_operand.hbm [shape: f32[8,128], index: 3, kind: output, shape index: {}]  }
   0x1   :  { %9 = vsyncpa [#allocation6], 0 }
   0x2   :  { %10 = vsyncpa [#allocation4], 0  ;;  %s224_s12 = smov [#allocation2]   ;;  %s225_s14 = smov [#allocation5]  }
   0x3   :  { %s17_s13 = sshll.u32 %s224_s12, 4  ;;  %s26_s15 = sshll.u32 %s225_s14, 4  ;;  %s18_s13 = int_to_ptr.vmem [resolvable:$true] %s17_s13  ;;  %s251_s15 = int_to_ptr.vmem [resolvable:$true] %s26_s15 }
   0x4   :  { %s152_s18 = scalar_lea.hbm %s297_s0, 128 }
   0x5   :  { %p153_p0 = scmp.ne.s32.totalorder %s297_s0, %s152_s18  ;;  %p156_p1 = scmp.lt.u32.totalorder %s152_s18, %s297_s0 }
   0x7   :  { %p158_p2 = pnand %p156_p1, %p153_p0 }
   0x9   :  { %161 = shalt.err (!%p158_p2)
}
   0xa   :  { %s162_s23 = scalar_lea.vmem %s18_s13, 128  ;;  %p167_p4 = scmp.lt.s32.totalorder %s18_s13, %s18_s13 }
   0xb   :  { %p163_p3 = scmp.ne.s32.totalorder %s18_s13, %s162_s23  ;;  %p168_p5 = scmp.lt.s32.totalorder %s162_s23, %s162_s23 }
   0xd   :  { %p169_p6 = por %p168_p5, %p167_p4 }
   0xf   :  { %p170_p7 = pnand %p169_p6, %p163_p3 }
  0x11   :  { %173 = shalt.err (!%p170_p7)
}
  0x12   :  { %20 = dma.hbm_to_vmem [thread:$0]  %s297_s0, 128, %s18_s13, [#allocation3]  }
  0x13   :  { %s174_s28 = scalar_lea.hbm %s298_s1, 256 }
  0x14   :  { %p175_p8 = scmp.ne.s32.totalorder %s298_s1, %s174_s28  ;;  %p178_p9 = scmp.lt.u32.totalorder %s174_s28, %s298_s1 }
  0x16   :  { %p180_p10 = pnand %p178_p9, %p175_p8 }
  0x18   :  { %183 = shalt.err (!%p180_p10)
}
  0x19   :  { %s184_s6 = scalar_lea.vmem %s251_s15, 256  ;;  %p189_p12 = scmp.lt.s32.totalorder %s251_s15, %s251_s15 }
  0x1a   :  { %p185_p11 = scmp.ne.s32.totalorder %s251_s15, %s184_s6  ;;  %p190_p13 = scmp.lt.s32.totalorder %s184_s6, %s184_s6 }
  0x1c   :  { %p191_p0 = por %p190_p13, %p189_p12 }
  0x1e   :  { %p192_p1 = pnand %p191_p0, %p185_p11 }
  0x20   :  { %195 = shalt.err (!%p192_p1)
}
  0x21   :  { %s226_s0 = smov 64   ;;  %s227_s7 = smov 4  }
  0x22   :  { %32 = dma.hbm_to_vmem [thread:$0]  %s298_s1, 256, %s251_s15, [#allocation6], %s226_s0, %s226_s0, %s227_s7  }
  0x23   :  { %218 = dma.done.wait [#allocation3], 128  }
  0x24   :  { %219 = vsyncadd [#allocation3], 4294967168 }
  0x25   :  { %220 = dma.done.wait [#allocation6], 256  }
  0x26   :  { %221 = vsyncadd [#allocation6], 4294967040  ;;  %v228_v0 = vmov 0.0   ;;  %vm229_vm0 = vmmov 0   ;;  %v150_v1 = vld [vmem:[#allocation5] sm:$0xff]   ;;  %v151_v2 = vld [vmem:[#allocation5 + $0x8] sm:$0xff]  }
  0x27   :  { %135 = vmatprep.subr.bf16.mxu0 %v228_v0  ;;  %139 = vmatprep.mubr.msk.bf16.mxu0 %vm229_vm0, %v228_v0  ;;  %v42_v3 = vld [vmem:[#allocation2] sm:$0xff]  ;;  %vm67_vm1 = vcmask 261120   ;;  %s230_s1 = smov [#allocation7]  }
  0x28   :  { %136 = vmatpush3.bf16.msra.mxu0 %v150_v1  ;;  %v43_v4 = vpack.c.bf16 %v42_v3, %v42_v3  ;;  %v128_v5 = vld [vmem:[%s299_s2] ss:$0 sm:$0xff]  ;;  %s118_s12 = sshll.u32 %s230_s1, 4  ;;  %s119_s12 = int_to_ptr.vmem [resolvable:$true] %s118_s12 }
  0x29   :  { %137 = vmatprep.subr.bf16.mxu0 %v228_v0  ;;  %s196_s13 = scalar_lea.vmem %s119_s12, 128  ;;  %p201_p3 = scmp.lt.s32.totalorder %s119_s12, %s119_s12 }
  0x2a   :  { %p197_p2 = scmp.ne.s32.totalorder %s119_s12, %s196_s13  ;;  %p202_p4 = scmp.lt.s32.totalorder %s196_s13, %s196_s13 }
  0x2c   :  { %138 = vmatpush3.bf16.msra.mxu0 %v151_v2  ;;  %p203_p5 = por %p202_p4, %p201_p3 }
  0x2e   :  { %p204_p6 = pnand %p203_p5, %p197_p2 }
  0x2f   :  { %140 = vmatmul.mubr.msk.bf16.vlgmr.msra.gmra.mrb[0].mxu0 %vm67_vm1, %v43_v4 }
 0x102   :  { %v105_v6 = vpop.f32.mrb[0].mxu0 }
 0x103   :  { %v106_v7 = vadd.f32 %v128_v5, %v105_v6  ;;  %v141_v8 = vpop.f32.mrb[1].mxu0 }
 0x104   :  { %v108_v9 = vpop.f32.mrb[2].mxu0 }
 0x105   :  { %111 = vst [vmem:[#allocation7] sm:$0xff] %v106_v7  ;;  %v142_v10 = vpop.f32.mrb[3].mxu0 }
 0x106   :  { %207 = shalt.err (!%p204_p6)
}
 0x107   :  { %s208_s2 = scalar_lea.hbm %s300_s3, 128 }
 0x108   :  { %p209_p7 = scmp.ne.s32.totalorder %s300_s3, %s208_s2  ;;  %p212_p8 = scmp.lt.u32.totalorder %s208_s2, %s300_s3 }
 0x10a   :  { %p214_p9 = pnand %p212_p8, %p209_p7 }
 0x10c   :  { %217 = shalt.err (!%p214_p9)
}
 0x10d   :  { %121 = dma.vmem_to_hbm [thread:$0]  %s119_s12, 128, %s300_s3, [#allocation4]  }
 0x10e   :  { %222 = dma.done.wait [#allocation4], 128  }
 0x10f   :  { %223 = vsyncadd [#allocation4], 4294967168 }
 0x110   :  { %125 = vsyncpa [#allocation3], 1 }
 0x111   :  { %126 = vsyncpa [#allocation6], 1 }
 0x112   :  { %127 = vsyncpa [#allocation4], 1 }

</bundles_post_ra>
